<compile_context>
chip_gen: v6e
topology: v6e:2x2x1
jax: 0.10.0
libtpu: 0.0.40
codegen_flags: <defaults>
</compile_context>

<pallas_src>
import functools

import jax
import jax.numpy as jnp
from jax import lax
from jax.experimental import pallas as pl
from jax.experimental.pallas import tpu as pltpu


def _supcon_kernel(feat_ref, lab_row_ref, lab_col_ref, num_pos_ref, loss_ref, *,
                   temperature, scale_by_temperature, mxu_dtype):
    # Blocks:
    #   feat_ref    : (TB, bank, D)   native dtype
    #   lab_row_ref : (TB, 1, bank)   int32
    #   lab_col_ref : (TB, bank, 1)   int32
    #   num_pos_ref : (TB, bank, 1)   float32   (|P(i)| per anchor, precomputed)
    #   loss_ref    : (TB, bank, 1)   float32
    inv_t = 1.0 / temperature
    bank = feat_ref.shape[1]

    f = feat_ref[...].astype(jnp.float32)                         # (TB, bank, D)

    # F.normalize(features, p=2, dim=2): x / max(||x||, 1e-12)
    #   == x * rsqrt(max(sum(x^2), 1e-24))   (EUP rsqrt, same clamp semantics)
    sumsq = jnp.sum(f * f, axis=-1, keepdims=True)                 # (TB, bank, 1)
    f = f * lax.rsqrt(jnp.maximum(sumsq, 1e-24))

    # bf16 inputs hit the MXU's native rate on v5e/v6e/v7x; accumulate in f32.
    fm = f.astype(mxu_dtype)
    adc = jnp.einsum('bnd,bmd->bnm', fm, fm,
                     preferred_element_type=jnp.float32) * inv_t   # (TB, bank, bank)

    # Row-wise softmax statistics, exactly mirroring the PyTorch reference.
    logits_max = jnp.max(adc, axis=-1, keepdims=True)              # (TB, bank, 1)
    logits = adc - logits_max
    exp_logits = jnp.exp(logits)

    # Shared (bank, bank) diagonal mask (broadcast over the batch block).
    rows = lax.broadcasted_iota(jnp.int32, (bank, bank), 0)
    cols = lax.broadcasted_iota(jnp.int32, (bank, bank), 1)
    not_diag = (rows != cols)[None, :, :]                          # (1, bank, bank)

    # Label-equality mask; positives exclude the self entry.
    same_lab = lab_col_ref[...] == lab_row_ref[...]                # (TB, bank, bank)
    pos_mask = jnp.logical_and(same_lab, not_diag)

    # denominator = sum over all non-self entries (positives + negatives).
    # Masked sum (not "full sum minus exp(diag)") -> no cancellation.
    denom = jnp.sum(jnp.where(not_diag, exp_logits, 0.0),
                    axis=-1, keepdims=True)                        # (TB, bank, 1)
    log_denom = jnp.log(denom)

    sum_pos_logits = jnp.sum(jnp.where(pos_mask, logits, 0.0),
                             axis=-1, keepdims=True)               # (TB, bank, 1)

    num_pos = num_pos_ref[...]                                     # (TB, bank, 1)
    # mean log-prob over positives; exact division (0/0 -> NaN, as in PyTorch).
    mean_log_prob = (sum_pos_logits - num_pos * log_denom) / num_pos
    loss = -mean_log_prob
    if scale_by_temperature:
        loss = loss * temperature

    loss_ref[...] = loss.astype(loss_ref.dtype)


def _vmem_limit_bytes():
    """Generation-aware VMEM budget (~100 MiB on 128-MiB v5e/v6e, ~50 MiB on
    64-MiB v7x), with a conservative fallback if the query is unavailable."""
    cap = 64 * 1024 * 1024
    try:
        info = pltpu.get_tpu_info()
        cap = int(getattr(info, "vmem_capacity_bytes", None)
                  or getattr(info, "vmem_size_bytes", None) or cap)
    except Exception:
        pass
    return max(32 * 1024 * 1024, int(cap * 0.78))


def _pick_block_b(B, bank, D, feat_itemsize, vmem_limit):
    """Largest batch block whose per-step working set fits the VMEM budget,
    while keeping >= 2 grid steps (megacore sharding + DMA/compute pipelining)."""
    per_elem = (2 * bank * D * feat_itemsize   # double-buffered native feature tile
                + bank * D * 6                 # f32-normalized + bf16 MXU copies
                + 28 * bank * bank             # ~7 live bank^2 f32/bool temporaries
                + 4096 * bank)                 # lane-padded (bank,1)/(1,bank) blocks
    budget = int(vmem_limit * 0.85)
    tb = max(1, min(B, budget // max(per_elem, 1)))
    if B >= 2:
        tb = max(1, min(tb, B // 2))           # never collapse to a single grid step
    while B % tb:                              # keep the grid exact (no ragged block)
        tb -= 1
    return tb


def supcon_loss(features, labels, temperature=0.07, scale_by_temperature=False,
                mxu_dtype=jnp.bfloat16):
    """Returns (loss_m, loss) exactly like SupConLoss.forward(features, labels)."""
    B, bank, D = features.shape
    lab_i32 = labels.astype(jnp.int32)
    # Both orientations of the tiny label array are fed (a few KB of DMA) so the
    # equality mask is a pure broadcast compare, with no in-kernel relayout.
    lab_row = lab_i32.reshape(B, 1, bank)
    lab_col = lab_i32.reshape(B, bank, 1)
    # |P(i)| per anchor, precomputed as a tiny XLA fusion (removes one bank^2
    # in-kernel reduction).
    num_pos = (jnp.sum(lab_i32[:, :, None] == lab_i32[:, None, :],
                       axis=-1).astype(jnp.float32) - 1.0).reshape(B, bank, 1)

    vmem_limit = _vmem_limit_bytes()
    tb = _pick_block_b(B, bank, D, jnp.dtype(features.dtype).itemsize, vmem_limit)

    kernel = functools.partial(
        _supcon_kernel,
        temperature=float(temperature),
        scale_by_temperature=bool(scale_by_temperature),
        mxu_dtype=mxu_dtype,
    )

    loss3 = pl.pallas_call(
        kernel,
        out_shape=jax.ShapeDtypeStruct((B, bank, 1), jnp.float32),
        grid_spec=pltpu.PrefetchScalarGridSpec(
            num_scalar_prefetch=0,
            grid=(B // tb,),
            in_specs=[
                pl.BlockSpec((tb, bank, D), lambda b: (b, 0, 0)),
                pl.BlockSpec((tb, 1, bank), lambda b: (b, 0, 0)),
                pl.BlockSpec((tb, bank, 1), lambda b: (b, 0, 0)),
                pl.BlockSpec((tb, bank, 1), lambda b: (b, 0, 0)),
            ],
            out_specs=pl.BlockSpec((tb, bank, 1), lambda b: (b, 0, 0)),
        ),
        compiler_params=pltpu.CompilerParams(
            dimension_semantics=("parallel",),
            vmem_limit_bytes=vmem_limit,
        ),
    )(features, lab_row, lab_col, num_pos)

    loss = loss3.reshape(B, bank)

    # loss_m = loss.sum() / torch.nonzero(loss).shape[0]
    nonzero_count = jnp.count_nonzero(loss).astype(jnp.float32)
    loss_m = jnp.sum(loss) / nonzero_count
    return loss_m, loss


def _supcon_ref(features, labels, temperature=0.07, scale_by_temperature=False,
                mxu_dtype=jnp.float32):
    """Pure-JAX mirror of the PyTorch module (mxu_dtype mirrors the kernel's
    MXU input precision choice; everything else is f32)."""
    f = features.astype(jnp.float32)
    sumsq = jnp.sum(f * f, axis=2, keepdims=True)
    f = f * lax.rsqrt(jnp.maximum(sumsq, 1e-24))   # == x / max(||x||, 1e-12)
    fm = f.astype(mxu_dtype)
    adc = jnp.einsum('bnd,bmd->bnm', fm, fm, preferred_element_type=jnp.float32,
                     precision=lax.Precision.HIGHEST) / temperature
    logits_max = jnp.max(adc, axis=2, keepdims=True)
    logits = adc - logits_max
    exp_logits = jnp.exp(logits)
    lab = labels[:, :, None]
    mask = (lab == jnp.swapaxes(lab, 1, 2)).astype(jnp.float32)
    eye = jnp.eye(features.shape[1], dtype=jnp.float32)[None]
    pos = mask * (1.0 - eye)
    neg = 1.0 - mask
    num_pos = jnp.sum(pos, axis=2)
    denom = (jnp.sum(exp_logits * neg, axis=2, keepdims=True)
             + jnp.sum(exp_logits * pos, axis=2, keepdims=True))
    log_probs = logits - jnp.log(denom)
    lp = jnp.sum(log_probs * pos, axis=2) / num_pos
    loss = -lp
    if scale_by_temperature:
        loss = loss * temperature
    loss_m = jnp.sum(loss) / jnp.count_nonzero(loss).astype(jnp.float32)
    return loss_m, loss


if __name__ == "__main__":
    key = jax.random.PRNGKey(0)
    B, bank, D = 2, 8, 32

    features = jax.random.normal(key, (B, bank, D), dtype=jnp.float32)
    # Each label appears at least twice per row so every anchor has positives
    # (matches intended SupCon usage; otherwise the reference produces NaN).
    labels = jnp.array(
        [[0, 0, 1, 1, 2, 2, 3, 3],
         [0, 1, 0, 1, 2, 2, 3, 3]],
        dtype=jnp.int32,
    )

    loss_m, loss = supcon_loss(features, labels, temperature=0.07,
                               scale_by_temperature=False)
    jax.block_until_ready((loss_m, loss))

    # Sanity check against a pure-JAX mirror using the same bf16 MXU inputs.
    ref_m, ref = _supcon_ref(features, labels, temperature=0.07,
                             scale_by_temperature=False, mxu_dtype=jnp.bfloat16)
    assert bool(jnp.allclose(loss, ref, rtol=2e-3, atol=2e-3)), "loss mismatch"
    assert bool(jnp.allclose(loss_m, ref_m, rtol=2e-3, atol=2e-3)), "loss_m mismatch"

    print("KERNEL_OK")
</pallas_src>

<mosaic_0001>
module attributes {stable_mosaic.version = 11 : i64} {
  func.func @_supcon_kernel(%arg0: i32, %arg1: memref<1x8x32xf32, #tpu.memory_space<vmem>>, %arg2: memref<1x1x8xi32, #tpu.memory_space<vmem>>, %arg3: memref<1x8x1xi32, #tpu.memory_space<vmem>>, %arg4: memref<1x8x1xf32, #tpu.memory_space<vmem>>, %arg5: memref<1x8x1xf32, #tpu.memory_space<vmem>>) attributes {dimension_semantics = [#tpu.dimension_semantics<parallel>], iteration_bounds = array<i64: 2>, scalar_prefetch = 0 : i64, scratch_operands = 0 : i64, tpu.core_type = #tpu.core_type<tc>, window_params = [{transform_indices = @transform_0, window_bounds = array<i64: 1, 8, 32>}, {transform_indices = @transform_1, window_bounds = array<i64: 1, 1, 8>}, {transform_indices = @transform_2, window_bounds = array<i64: 1, 8, 1>}, {transform_indices = @transform_3, window_bounds = array<i64: 1, 8, 1>}, {transform_indices = @transform_4, window_bounds = array<i64: 1, 8, 1>}]} {
    %c0 = arith.constant 0 : index
    %c0_0 = arith.constant 0 : index
    %c0_1 = arith.constant 0 : index
    %0 = vector.load %arg1[%c0, %c0_0, %c0_1] : memref<1x8x32xf32, #tpu.memory_space<vmem>>, vector<1x8x32xf32>
    %1 = arith.mulf %0, %0 : vector<1x8x32xf32>
    %cst = arith.constant dense<0.000000e+00> : vector<1x8xf32>
    %2 = vector.multi_reduction <add>, %1, %cst [2] : vector<1x8x32xf32> to vector<1x8xf32>
    %3 = vector.shape_cast %2 : vector<1x8xf32> to vector<1x8x1xf32>
    %cst_2 = arith.constant 1.000000e-24 : f32
    %4 = vector.broadcast %cst_2 : f32 to vector<1x8x1xf32>
    %5 = arith.maximumf %3, %4 : vector<1x8x1xf32>
    %6 = math.rsqrt %5 : vector<1x8x1xf32>
    %7 = vector.broadcast %6 : vector<1x8x1xf32> to vector<1x8x32xf32>
    %8 = arith.mulf %0, %7 : vector<1x8x32xf32>
    %9 = arith.truncf %8 : vector<1x8x32xf32> to vector<1x8x32xbf16>
    "tpu.trace_start"() <{level = 10 : i32, message = "bnd,bmd->bnm"}> : () -> ()
    %cst_3 = arith.constant dense<0.000000e+00> : vector<1x8x8xf32>
    %10 = tpu.matmul %9, %9, %cst_3 {dimension_numbers = #tpu.dot_dimension_numbers<[2], [2], [1], [1], [0, 0, 0, 1, 1, 1], [0], [0]>} : vector<1x8x32xbf16>, vector<1x8x32xbf16>, vector<1x8x8xf32> -> vector<1x8x8xf32>
    "tpu.trace_stop"() : () -> ()
    %cst_4 = arith.constant 14.2857141 : f32
    %11 = vector.broadcast %cst_4 : f32 to vector<1x8x8xf32>
    %12 = arith.mulf %10, %11 : vector<1x8x8xf32>
    %cst_5 = arith.constant dense<0xFF800000> : vector<1x8xf32>
    %13 = vector.multi_reduction <maximumf>, %12, %cst_5 [2] : vector<1x8x8xf32> to vector<1x8xf32>
    %14 = vector.shape_cast %13 : vector<1x8xf32> to vector<1x8x1xf32>
    %15 = vector.broadcast %14 : vector<1x8x1xf32> to vector<1x8x8xf32>
    %16 = arith.subf %12, %15 : vector<1x8x8xf32>
    %17 = math.exp %16 : vector<1x8x8xf32>
    %18 = tpu.iota {dimensions = array<i32: 0>} : vector<8x8xi32>
    %19 = tpu.iota {dimensions = array<i32: 1>} : vector<8x8xi32>
    %20 = arith.cmpi ne, %18, %19 : vector<8x8xi32>
    %21 = vector.shape_cast %20 : vector<8x8xi1> to vector<1x8x8xi1>
    %c0_6 = arith.constant 0 : index
    %c0_7 = arith.constant 0 : index
    %c0_8 = arith.constant 0 : index
    %22 = vector.load %arg3[%c0_6, %c0_7, %c0_8] : memref<1x8x1xi32, #tpu.memory_space<vmem>>, vector<1x8x1xi32>
    %c0_9 = arith.constant 0 : index
    %c0_10 = arith.constant 0 : index
    %c0_11 = arith.constant 0 : index
    %23 = vector.load %arg2[%c0_9, %c0_10, %c0_11] : memref<1x1x8xi32, #tpu.memory_space<vmem>>, vector<1x1x8xi32>
    %24 = vector.broadcast %22 : vector<1x8x1xi32> to vector<1x8x8xi32>
    %25 = vector.broadcast %23 : vector<1x1x8xi32> to vector<1x8x8xi32>
    %26 = arith.cmpi eq, %24, %25 : vector<1x8x8xi32>
    %27 = arith.andi %26, %21 : vector<1x8x8xi1>
    %cst_12 = arith.constant 0.000000e+00 : f32
    %28 = vector.broadcast %cst_12 : f32 to vector<1x8x8xf32>
    %29 = arith.select %21, %17, %28 : vector<1x8x8xi1>, vector<1x8x8xf32>
    %cst_13 = arith.constant dense<0.000000e+00> : vector<1x8xf32>
    %30 = vector.multi_reduction <add>, %29, %cst_13 [2] : vector<1x8x8xf32> to vector<1x8xf32>
    %31 = vector.shape_cast %30 : vector<1x8xf32> to vector<1x8x1xf32>
    %32 = math.log %31 : vector<1x8x1xf32>
    %cst_14 = arith.constant 0.000000e+00 : f32
    %33 = vector.broadcast %cst_14 : f32 to vector<1x8x8xf32>
    %34 = arith.select %27, %16, %33 : vector<1x8x8xi1>, vector<1x8x8xf32>
    %cst_15 = arith.constant dense<0.000000e+00> : vector<1x8xf32>
    %35 = vector.multi_reduction <add>, %34, %cst_15 [2] : vector<1x8x8xf32> to vector<1x8xf32>
    %36 = vector.shape_cast %35 : vector<1x8xf32> to vector<1x8x1xf32>
    %c0_16 = arith.constant 0 : index
    %c0_17 = arith.constant 0 : index
    %c0_18 = arith.constant 0 : index
    %37 = vector.load %arg4[%c0_16, %c0_17, %c0_18] : memref<1x8x1xf32, #tpu.memory_space<vmem>>, vector<1x8x1xf32>
    %38 = arith.mulf %37, %32 : vector<1x8x1xf32>
    %39 = arith.subf %36, %38 : vector<1x8x1xf32>
    %40 = arith.divf %39, %37 : vector<1x8x1xf32>
    %cst_19 = arith.constant 0.000000e+00 : f32
    %41 = vector.broadcast %cst_19 : f32 to vector<1x8x1xf32>
    %42 = arith.subf %41, %40 : vector<1x8x1xf32>
    %c0_20 = arith.constant 0 : index
    %c0_21 = arith.constant 0 : index
    %c0_22 = arith.constant 0 : index
    %43 = vector.load %arg5[%c0_20, %c0_21, %c0_22] : memref<1x8x1xf32, #tpu.memory_space<vmem>>, vector<1x8x1xf32>
    tpu.vector_store %arg5[%c0_20, %c0_21, %c0_22], %42 {strides = array<i32>} : memref<1x8x1xf32, #tpu.memory_space<vmem>>, vector<1x8x1xf32>,
    return
  }
  func.func @transform_0(%arg0: i32) -> (i32, i32, i32) {
    %c0_i32 = arith.constant 0 : i32
    %c0_i32_0 = arith.constant 0 : i32
    %c0_i32_1 = arith.constant 0 : i32
    return %arg0, %c0_i32, %c0_i32_0 : i32, i32, i32
  }
  func.func @transform_1(%arg0: i32) -> (i32, i32, i32) {
    %c0_i32 = arith.constant 0 : i32
    %c0_i32_0 = arith.constant 0 : i32
    %c0_i32_1 = arith.constant 0 : i32
    return %arg0, %c0_i32, %c0_i32_0 : i32, i32, i32
  }
  func.func @transform_2(%arg0: i32) -> (i32, i32, i32) {
    %c0_i32 = arith.constant 0 : i32
    %c0_i32_0 = arith.constant 0 : i32
    %c0_i32_1 = arith.constant 0 : i32
    return %arg0, %c0_i32, %c0_i32_0 : i32, i32, i32
  }
  func.func @transform_3(%arg0: i32) -> (i32, i32, i32) {
    %c0_i32 = arith.constant 0 : i32
    %c0_i32_0 = arith.constant 0 : i32
    %c0_i32_1 = arith.constant 0 : i32
    return %arg0, %c0_i32, %c0_i32_0 : i32, i32, i32
  }
  func.func @transform_4(%arg0: i32) -> (i32, i32, i32) {
    %c0_i32 = arith.constant 0 : i32
    %c0_i32_0 = arith.constant 0 : i32
    %c0_i32_1 = arith.constant 0 : i32
    return %arg0, %c0_i32, %c0_i32_0 : i32, i32, i32
  }
}

</mosaic_0001>

<bundles_post_ra>
// kernel: tpu_custom_call.1
= control target key start
LH: loop header
LB: loop body
LE: loop exit
PB: predicated region body
PF: predicated region fallthrough
CT: control target
= control target key end

     0   :  { %s501_s15 = smov 0   ;;  %s543_s0 = inlined_call_operand.vmem [shape: f32[2,8,32], index: 0, kind: input, shape index: {}]   ;;  %s544_s1 = inlined_call_operand.vmem [shape: s32[2,1,8], index: 1, kind: input, shape index: {}]   ;;  %s545_s2 = inlined_call_operand.vmem [shape: s32[2,8,1], index: 2, kind: input, shape index: {}]   ;;  %s546_s3 = inlined_call_operand.vmem [shape: f32[2,8,1], index: 3, kind: input, shape index: {}]   ;;  %s547_s4 = inlined_call_operand.vmem [shape: f32[2,8,1], index: 4, kind: output, shape index: {}]  }
   0x1 LB: > { %s423_s16 = sadd.s32 4294967295, %s471_s15   ;;  %p427_p0 = scmp.ge.s32.totalorder %s471_s15, 1  ;;  %s471_s15 = sphi %s501_s15, %s14_s15  }
   0x2   : > { %p187_p1 = scmp.lt.s32.totalorder %s471_s15, 3 }
   0x4   : > { %p188_p2 = pnand %p427_p0, %p187_p1 }
   0x5   : > { %p222_p3 = scmp.lt.s32.totalorder (!%p188_p2), %s423_s16, 1 }
   0x6   : > { %191 = sbr.rel (%p188_p2) target bundleno = 701 (0x2bd), region = 36 }
   0xb   : > { %s549_s16 = smov (!%p222_p3, %s423_s16), 1  ;;  %vm244_vm0 = vcmask 261120   ;;  %v473_v3 = vmov 0.0   ;;  %vm474_vm1 = vmmov 0   ;;  %v475_v10 = vmov 0  }
   0xc   : > { %s512_s17 = sshll.u32 %s549_s16, 3  ;;  %438 = vmatprep.subr.bf16.mxu0 %v473_v3  ;;  %440 = vmatprep.mubr.msk.bf16.mxu0 %vm474_vm1, %v473_v3  ;;  %vm296_vm2 = vcmask 64512   ;;  %v303_v18 = vlaneseq  ;;  %s228_s26 = scalar_lea.vmem %s544_s1, %s549_s16  ;;  %vm335_vm6 = vcmask 7168  }
   0xd   : > { %s225_s20 = scalar_lea.vmem %s543_s0, %s512_s17  ;;  %s232_s23 = scalar_lea.vmem %s545_s2, %s512_s17  ;;  %455 = vset.pattern.permute.xlu1 %v475_v10  ;;  %456 = vset.pattern.permute.xlu0 %v475_v10  ;;  %v433_v21 = vld [vmem:[%s228_s26] ss:$0 sm:$0xff] }
   0xe   : > { %v242_v0 = vld [vmem:[%s225_s20] sm:$0xff]  ;;  %v304_v19 = vshrl.u32 %v303_v18, 7  ;;  %v306_v20 = vand.u32 127, %v303_v18  ;;  %s236_s29 = scalar_lea.vmem %s546_s3, %s512_s17  ;;  %s240_s6 = scalar_lea.vmem %s547_s4, %s512_s17 }
   0xf   : > { %v243_v1 = vmul.f32 %v242_v0, %v242_v0  ;;  %v308_v11 = vld [vmem:[%s232_s23] sm:$0xff] }
  0x10   : > { %311 = vperm.xlu1 %455, %v308_v11   ;;  %vm307_vm3 = vcmp.ne.s32.totalorder %v304_v19, %v306_v20  ;;  %v329_v32 = vld [vmem:[%s236_s29] sm:$0xff] }
  0x11   : > { %v245_v2 = vsel %vm244_vm0, %v243_v1, 0.0 }
  0x12   : > { %246 = vadd.xlane.f32.xlu0 %v245_v2 }
  0x8b   : > { %v312_v22 = vpop.permute.xlu1 %311 }
  0x8c   : > { %vm317_vm4 = vcmp.eq.s32.totalorder %v312_v22, %v433_v21 }
  0x8d   : > { %vm318_vm5 = vmand %vm317_vm4, %vm307_vm3 }
  0x9b   : > { %v247_v4 = vpop.xlane.xlu0 %246 }
  0x9c   : > { %v248_v5 = vmax.f32 %v247_v4, 1e-24 }
  0x9e   : > { %457 = vrsqrt.f32 %v248_v5 }
  0xab   : > { %v458_v6 = vpop.eup %457 }
  0xac   : > { %v250_v7 = vmul.f32 %v458_v6, %v242_v0 }
  0xae   : > { %v251_v8 = vpack.c.bf16 %v250_v7, %v250_v7 }
  0xb0   : > { %v253_v9 = vsel %vm244_vm0, %v251_v8, 0 }
  0xb1   : > { %439 = vmatpush3.bf16.xpose.msra.mxu0 %v253_v9 }
  0xb8   : > { %441 = vmatmul.mubr.msk.bf16.vlgmr.msra.gmra.mxu0 %vm244_vm0, %v251_v8 }
 0x178   : > { %v289_v12 = vpop.f32.mrf.mxu0 }
 0x179   : > { %v295_v13 = vmul.f32 14.285714, %v289_v12 }
 0x17a   : > { %v442_v14 = vpop.f32.mrf.mxu0 }
 0x17b   : > { %v297_v15 = vsel %vm296_vm2, %v295_v13, -inf }
 0x17c   : > { %298 = vmax.xlane.f32.xlu0 %v297_v15  ;;  %v292_v16 = vpop.f32.mrf.mxu0 }
 0x17e   : > { %v443_v17 = vpop.f32.mrf.mxu0 }
 0x205   : > { %v299_v23 = vpop.xlane.xlu0 %298 }
 0x206   : > { %v300_v24 = vsub.f32 %v295_v13, %v299_v23 }
 0x208   : > { %v301_v25 = vmul.f32 1.442695, %v300_v24  ;;  %v325_v26 = vsel %vm318_vm5, %v300_v24, 0.0 }
 0x209   : > { %v326_v27 = vsel %vm296_vm2, %v325_v26, 0.0 }
 0x20a   : > { %459 = vpow2.f32 %v301_v25  ;;  %327 = vadd.xlane.f32.xlu0 %v326_v27 }
 0x217   : > { %v460_v28 = vpop.eup %459 }
 0x218   : > { %v319_v29 = vsel %vm307_vm3, %v460_v28, 0.0 }
 0x219   : > { %v320_v30 = vsel %vm296_vm2, %v319_v29, 0.0 }
 0x21a   : > { %321 = vadd.xlane.f32.xlu1 %v320_v30 }
 0x293   : > { %v328_v37 = vpop.xlane.xlu0 %327 }
 0x2a3   : > { %v322_v31 = vpop.xlane.xlu1 %321 }
 0x2a4   : > { %461 = vlog2.f32 %v322_v31 }
 0x2a5   : > { %463 = vrcp.f32 %v329_v32 }
 0x2b1   : > { %v462_v33 = vpop.eup %461 }
 0x2b2   : > { %v324_v34 = vmul.f32 0.6931472, %v462_v33  ;;  %v464_v36 = vpop.eup %463 }
 0x2b4   : > { %v330_v35 = vmul.f32 %v329_v32, %v324_v34 }
 0x2b6   : > { %v331_v38 = vsub.f32 %v328_v37, %v330_v35 }
 0x2b8   : > { %v333_v39 = vmul.f32 %v464_v36, %v331_v38 }
 0x2ba   : > { %v334_v40 = vsub.f32 0.0, %v333_v39 }
 0x2bc   : > { %336 = vst.msk [vmem:[%s240_s6] sm:$0xff] %vm335_vm6, %v334_v40 }
 0x2bd PF: > { %s14_s15 = sadd.s32 1, %s471_s15  }
 0x2be   : > { %p11_p4 = scmp.ge.s32.totalorder %s14_s15, 4  }
 0x2c0   :  { %13 = sbr.rel (!%p11_p4) target bundleno = 1 (0x1), region = 75 }

</bundles_post_ra>
